<compile_context>
chip_gen: v5e
topology: v5e:2x2
jax: 0.10.0
libtpu: 0.0.40
codegen_flags: <defaults>
</compile_context>

<pallas_src>
import functools
import itertools

import jax
import jax.numpy as jnp
from jax.experimental import pallas as pl
from jax.experimental.pallas import tpu as pltpu


# ----------------------------------------------------------------------------
# Sub-policy enumeration (get_sub_policies): all length-`sub_policy_dim`
# combinations of a fixed op set.
# ----------------------------------------------------------------------------
NUM_OPS = 8            # number of base augmentation ops
SUB_POLICY_DIM = 2     # ops per sub-policy
HIDDEN = 32            # policy-predictor hidden width

LANES = 128            # TPU lane width
SUBLANES = 8           # TPU sublane count (f32)

# Packed parameter-slab layout (rows; all offsets are multiples of 8).
_Z_OFF, _Z_LEN = 0, SUBLANES          # embedding, replicated over 8 sublanes
_W1_OFF, _W1_LEN = 8, LANES           # hidden weights, lane-dense padded square
_B1_OFF, _B1_LEN = 136, SUBLANES      # hidden bias, replicated over 8 sublanes
_WH_OFF, _WH_LEN = 144, LANES         # fused head weights (Wp | Wm), padded
_BH_OFF, _BH_LEN = 272, SUBLANES      # fused head bias, replicated
_SLAB_ROWS = 280


def get_sub_policies(sub_policy_dim):
    return list(itertools.combinations(range(NUM_OPS), sub_policy_dim))


# ----------------------------------------------------------------------------
# Pallas kernel: PolicyPredictor forward (fully lane-dense, single in / out).
#   h      = relu(z @ W1 + b1)                     [8, 128]
#   logits = h @ W_heads + b_heads                 [8, 128]
#   out    = lane < P ? softmax(logits[:, :P]) : sigmoid(logits)
# ----------------------------------------------------------------------------
def _policy_predictor_kernel(params_ref, out_ref, *, num_sub_policies):
    P = num_sub_policies

    z = params_ref[_Z_OFF:_Z_OFF + _Z_LEN, :]        # [8, 128]
    w1 = params_ref[_W1_OFF:_W1_OFF + _W1_LEN, :]    # [128, 128]
    b1 = params_ref[_B1_OFF:_B1_OFF + _B1_LEN, :]    # [8, 128]
    wh = params_ref[_WH_OFF:_WH_OFF + _WH_LEN, :]    # [128, 128]
    bh = params_ref[_BH_OFF:_BH_OFF + _BH_LEN, :]    # [8, 128]

    # Hidden layer: one MXU pass + VPU ReLU. Pad lanes stay exactly zero.
    h = jnp.maximum(
        jnp.dot(z, w1, preferred_element_type=jnp.float32) + b1, 0.0)

    # Fused heads: a single MXU pass produces prob logits (lanes < P) and
    # magnitude logits (lanes P .. P + P*D - 1) in one lane-dense tile.
    logits = jnp.dot(h, wh, preferred_element_type=jnp.float32) + bh

    lane = jax.lax.broadcasted_iota(jnp.int32, logits.shape, 1)
    is_prob = lane < P

    # Probability head: numerically stable softmax over the valid prob lanes.
    prob_logits = jnp.where(is_prob, logits, jnp.float32(-1e30))
    m = jnp.max(prob_logits, axis=-1, keepdims=True)
    e = jnp.exp(prob_logits - m)
    denom = jnp.sum(e, axis=-1, keepdims=True)
    r = pl.reciprocal(denom, approx=True)        # EUP vrcp
    r = r * (2.0 - denom * r)                    # one Newton step -> f32 exact
    prob = e * r

    # Magnitude head: single EUP sigmoid over the whole tile (pad lanes ignored
    # by the wrapper).
    mag = jax.nn.sigmoid(logits)

    # Single lane-dense [8, 128] store: prob in lanes < P, mag elsewhere.
    out_ref[...] = jnp.where(is_prob, prob, mag)


def _vmem_spec():
    return pl.BlockSpec(memory_space=pltpu.MemorySpace.VMEM)


def policy_predictor_forward(param_slab, num_sub_policies, sub_policy_dim):
    """Runs the Pallas kernel; returns (prob [P], mag [P, D])."""
    P = num_sub_policies
    D = sub_policy_dim

    out = pl.pallas_call(
        functools.partial(_policy_predictor_kernel, num_sub_policies=P),
        out_shape=jax.ShapeDtypeStruct((SUBLANES, LANES), jnp.float32),
        in_specs=[_vmem_spec()],
        out_specs=_vmem_spec(),
        cost_estimate=pl.CostEstimate(
            flops=2 * SUBLANES * LANES * LANES * 2,      # two 8x128x128 matmuls
            transcendentals=2 * SUBLANES * LANES,        # exp + sigmoid
            bytes_accessed=(_SLAB_ROWS + SUBLANES) * LANES * 4,
        ),
    )(param_slab)

    prob = out[0, :P]                                 # matches prob_sub_policy [P]
    mag = out[0, P:P + P * D].reshape(P, D)           # matches mag_sub_policy [P, D]
    return prob, mag


# ----------------------------------------------------------------------------
# OptAug (JAX/Pallas version) — forward only.
# ----------------------------------------------------------------------------
class OptAugPallas:
    def __init__(self, sub_policy_dim=SUB_POLICY_DIM, aug_mult=3, name="optaug",
                 hidden=HIDDEN, seed=0):
        self.sub_policy_dim = sub_policy_dim
        self.aug_mult = aug_mult
        self.name = name
        self.sub_policies = jnp.asarray(get_sub_policies(sub_policy_dim),
                                        dtype=jnp.int32)
        self.num_sub_policies = int(self.sub_policies.shape[0])

        P, D, H = self.num_sub_policies, self.sub_policy_dim, hidden
        assert P + P * D <= LANES, "fused head width must fit in 128 lanes"
        assert H <= LANES

        # Deterministic parameter init (synthetic; no checkpoint loading).
        key = jax.random.PRNGKey(seed)
        kz, k1, kp, km = jax.random.split(key, 4)
        scale = 0.1
        z = scale * jax.random.normal(kz, (1, H), jnp.float32)    # learned embedding
        w1 = scale * jax.random.normal(k1, (H, H), jnp.float32)
        b1 = jnp.zeros((1, H), jnp.float32)
        wp = scale * jax.random.normal(kp, (H, P), jnp.float32)
        bp = jnp.zeros((1, P), jnp.float32)
        wm = scale * jax.random.normal(km, (H, P * D), jnp.float32)
        bm = jnp.zeros((1, P * D), jnp.float32)

        # Pack everything once into a single pre-padded lane-dense VMEM slab.
        self.param_slab = self._pack_params(z, w1, b1, wp, bp, wm, bm, H, P, D)

    @staticmethod
    def _pack_params(z, w1, b1, wp, bp, wm, bm, H, P, D):
        slab = jnp.zeros((_SLAB_ROWS, LANES), jnp.float32)
        # embedding, replicated across the 8 sublanes (MXU does 8 rows for free)
        slab = slab.at[_Z_OFF:_Z_OFF + SUBLANES, 0:H].set(
            jnp.broadcast_to(z.reshape(1, H), (SUBLANES, H)))
        # hidden weights, zero-padded to a lane-dense 128x128 square
        slab = slab.at[_W1_OFF:_W1_OFF + H, 0:H].set(w1)
        slab = slab.at[_B1_OFF:_B1_OFF + SUBLANES, 0:H].set(
            jnp.broadcast_to(b1.reshape(1, H), (SUBLANES, H)))
        # fused head weights: [H, P + P*D] padded to 128x128
        w_heads = jnp.concatenate([wp, wm], axis=1)
        slab = slab.at[_WH_OFF:_WH_OFF + H, 0:P + P * D].set(w_heads)
        b_heads = jnp.concatenate([bp.reshape(-1), bm.reshape(-1)])
        slab = slab.at[_BH_OFF:_BH_OFF + SUBLANES, 0:P + P * D].set(
            jnp.broadcast_to(b_heads.reshape(1, -1), (SUBLANES, P + P * D)))
        return slab

    def __call__(self, x):
        # Exactly like the PyTorch module: forward(x) ignores x and returns
        # the policy predictor's output.
        del x
        return policy_predictor_forward(self.param_slab, self.num_sub_policies,
                                        self.sub_policy_dim)

    # TODO(synk): sample()/optimize() involve torch.multinomial, data-dependent
    # image augmentations (apply_augment) and an Adam update on an external
    # encoder — outside the scope of a single forward-pass kernel.


if __name__ == "__main__":
    key = jax.random.PRNGKey(0)
    # Small NCHW image batch consistent with the module's expected input.
    x = jax.random.normal(key, (2, 4, 16, 16), jnp.float32)

    model = OptAugPallas(sub_policy_dim=SUB_POLICY_DIM, aug_mult=3, name="optaug")
    prob, mag = model(x)
    prob = jax.block_until_ready(prob)
    mag = jax.block_until_ready(mag)

    # sanity checks
    assert prob.shape == (model.num_sub_policies,)
    assert mag.shape == (model.num_sub_policies, model.sub_policy_dim)
    assert bool(jnp.isfinite(prob).all()) and bool(jnp.isfinite(mag).all())
    assert abs(float(prob.sum()) - 1.0) < 1e-4
    assert float(mag.min()) >= 0.0 and float(mag.max()) <= 1.0

    print("KERNEL_OK")
</pallas_src>

<mosaic_0001>
module attributes {stable_mosaic.version = 11 : i64} {
  func.func @_policy_predictor_kernel(%arg0: memref<280x128xf32, #tpu.memory_space<vmem>>, %arg1: memref<8x128xf32, #tpu.memory_space<vmem>>) attributes {dimension_semantics = [], scalar_prefetch = 0 : i64, scratch_operands = 0 : i64, tpu.core_type = #tpu.core_type<tc>} {
    %c0 = arith.constant 0 : index
    %c0_0 = arith.constant 0 : index
    %0 = vector.load %arg0[%c0, %c0_0] : memref<280x128xf32, #tpu.memory_space<vmem>>, vector<8x128xf32>
    %c8 = arith.constant 8 : index
    %c0_1 = arith.constant 0 : index
    %1 = vector.load %arg0[%c8, %c0_1] : memref<280x128xf32, #tpu.memory_space<vmem>>, vector<128x128xf32>
    %c136 = arith.constant 136 : index
    %c0_2 = arith.constant 0 : index
    %2 = vector.load %arg0[%c136, %c0_2] : memref<280x128xf32, #tpu.memory_space<vmem>>, vector<8x128xf32>
    %c144 = arith.constant 144 : index
    %c0_3 = arith.constant 0 : index
    %3 = vector.load %arg0[%c144, %c0_3] : memref<280x128xf32, #tpu.memory_space<vmem>>, vector<128x128xf32>
    %c272 = arith.constant 272 : index
    %c0_4 = arith.constant 0 : index
    %4 = vector.load %arg0[%c272, %c0_4] : memref<280x128xf32, #tpu.memory_space<vmem>>, vector<8x128xf32>
    %cst = arith.constant dense<0.000000e+00> : vector<8x128xf32>
    %5 = tpu.matmul %0, %1, %cst {dimension_numbers = #tpu.dot_dimension_numbers<[1], [0], [0], [1], [0, 0, 1, 1], [], []>} : vector<8x128xf32>, vector<128x128xf32>, vector<8x128xf32> -> vector<8x128xf32>
    %6 = arith.addf %5, %2 : vector<8x128xf32>
    %cst_5 = arith.constant 0.000000e+00 : f32
    %7 = vector.broadcast %cst_5 : f32 to vector<8x128xf32>
    %8 = arith.maximumf %6, %7 : vector<8x128xf32>
    %cst_6 = arith.constant dense<0.000000e+00> : vector<8x128xf32>
    %9 = tpu.matmul %8, %3, %cst_6 {dimension_numbers = #tpu.dot_dimension_numbers<[1], [0], [0], [1], [0, 0, 1, 1], [], []>} : vector<8x128xf32>, vector<128x128xf32>, vector<8x128xf32> -> vector<8x128xf32>
    %10 = arith.addf %9, %4 : vector<8x128xf32>
    %11 = tpu.iota {dimensions = array<i32: 1>} : vector<8x128xi32>
    %c28_i32 = arith.constant 28 : i32
    %12 = vector.broadcast %c28_i32 : i32 to vector<8x128xi32>
    %13 = arith.cmpi slt, %11, %12 : vector<8x128xi32>
    %cst_7 = arith.constant -1.000000e+30 : f32
    %14 = vector.broadcast %cst_7 : f32 to vector<8x128xf32>
    %15 = arith.select %13, %10, %14 : vector<8x128xi1>, vector<8x128xf32>
    %cst_8 = arith.constant dense<0xFF800000> : vector<8xf32>
    %16 = vector.multi_reduction <maximumf>, %15, %cst_8 [1] : vector<8x128xf32> to vector<8xf32>
    %17 = vector.shape_cast %16 : vector<8xf32> to vector<8x1xf32>
    %18 = vector.broadcast %17 : vector<8x1xf32> to vector<8x128xf32>
    %19 = arith.subf %15, %18 : vector<8x128xf32>
    %20 = math.exp %19 : vector<8x128xf32>
    %cst_9 = arith.constant dense<0.000000e+00> : vector<8xf32>
    %21 = vector.multi_reduction <add>, %20, %cst_9 [1] : vector<8x128xf32> to vector<8xf32>
    %22 = vector.shape_cast %21 : vector<8xf32> to vector<8x1xf32>
    %23 = tpu.reciprocal %22 {approx = true} : vector<8x1xf32> -> vector<8x1xf32>
    %24 = arith.mulf %22, %23 : vector<8x1xf32>
    %cst_10 = arith.constant 2.000000e+00 : f32
    %25 = vector.broadcast %cst_10 : f32 to vector<8x1xf32>
    %26 = arith.subf %25, %24 : vector<8x1xf32>
    %27 = arith.mulf %23, %26 : vector<8x1xf32>
    %28 = vector.broadcast %27 : vector<8x1xf32> to vector<8x128xf32>
    %29 = arith.mulf %20, %28 : vector<8x128xf32>
    %30 = arith.negf %10 : vector<8x128xf32>
    %31 = math.exp %30 : vector<8x128xf32>
    %cst_11 = arith.constant 1.000000e+00 : f32
    %32 = vector.broadcast %cst_11 : f32 to vector<8x128xf32>
    %33 = arith.addf %32, %31 : vector<8x128xf32>
    %34 = arith.divf %32, %33 : vector<8x128xf32>
    %35 = arith.select %13, %29, %34 : vector<8x128xi1>, vector<8x128xf32>
    %c0_12 = arith.constant 0 : index
    %c0_13 = arith.constant 0 : index
    %36 = vector.load %arg1[%c0_12, %c0_13] : memref<8x128xf32, #tpu.memory_space<vmem>>, vector<8x128xf32>
    tpu.vector_store %arg1[%c0_12, %c0_13], %35 {strides = array<i32>} : memref<8x128xf32, #tpu.memory_space<vmem>>, vector<8x128xf32>,
    return
  }
}

</mosaic_0001>

<bundles_post_ra>
// kernel: tpu_custom_call.1
= control target key start
LH: loop header
LB: loop body
LE: loop exit
PB: predicated region body
PF: predicated region fallthrough
CT: control target
= control target key end

     0   :  { %6 = vsyncpa [#allocation3], 0  ;;  %s242_s0 = inlined_call_operand.hbm [shape: f32[280,128], index: 0, kind: input, shape index: {}]   ;;  %s243_s1 = inlined_call_operand.hbm [shape: f32[8,128], index: 1, kind: output, shape index: {}]  }
   0x1   :  { %7 = vsyncpa [#allocation4], 0  ;;  %s12_s8 = sshll.u32 %s242_s0, 4  ;;  %s220_s9 = smov [#allocation2]   ;;  %s13_s8 = int_to_ptr.hbm [resolvable:$true] %s12_s8 }
   0x2   :  { %s14_s10 = sshll.u32 %s220_s9, 4  ;;  %s221_s11 = smov 128   ;;  %s15_s10 = int_to_ptr.vmem [resolvable:$true] %s14_s10 }
   0x3   :  { %s222_s12 = smov 8  }
   0x4   :  { %20 = dma.hbm_to_vmem [thread:$0]  %s13_s8, 4480, %s15_s10, [#allocation3], %s221_s11, %s221_s11, %s222_s12  }
   0x5   :  { %216 = dma.done.wait [#allocation3], 4480  }
   0x6   :  { %217 = vsyncadd [#allocation3], 4294962816  ;;  %v41_v0 = vld [vmem:[#allocation2 + $0x80] sm:$0xff]  ;;  %v40_v1 = vld [vmem:[#allocation2 + $0x78] sm:$0xff]  ;;  %v101_v37 = vlaneseq  ;;  %s223_s0 = smov [#allocation5]   ;;  %s145_s16 = sshll.u32 %s243_s1, 4  ;;  %s146_s16 = int_to_ptr.hbm [resolvable:$true] %s145_s16 }
   0x7   :  { %60 = vmatpush.msra.mxu0 %v41_v0  ;;  %v39_v2 = vld [vmem:[#allocation2 + $0x70] sm:$0xff]  ;;  %v38_v3 = vld [vmem:[#allocation2 + $0x68] sm:$0xff]  ;;  %v37_v5 = vld [vmem:[#allocation2 + $0x60] sm:$0xff]  ;;  %s143_s13 = sshll.u32 %s223_s0, 4  ;;  %s144_s13 = int_to_ptr.vmem [resolvable:$true] %s143_s13 }
   0x8   :  { %v58_v4 = vld [vmem:[#allocation2 + $0x108] sm:$0xff]  ;;  %v57_v6 = vld [vmem:[#allocation2 + $0x100] sm:$0xff]  ;;  %v56_v7 = vld [vmem:[#allocation2 + $0xf8] sm:$0xff]  ;;  %v102_v38 = vand.u32 127, %v101_v37 }
   0x9   :  { %61 = vmatpush.msra.mxu0 %v40_v1  ;;  %81 = vmatpush.msra.mxu1 %v58_v4  ;;  %v36_v8 = vld [vmem:[#allocation2 + $0x58] sm:$0xff]  ;;  %v55_v9 = vld [vmem:[#allocation2 + $0xf0] sm:$0xff]  ;;  %v54_v11 = vld [vmem:[#allocation2 + $0xe8] sm:$0xff] }
   0xa   :  { %v35_v10 = vld [vmem:[#allocation2 + $0x50] sm:$0xff]  ;;  %v34_v12 = vld [vmem:[#allocation2 + $0x48] sm:$0xff]  ;;  %v53_v13 = vld [vmem:[#allocation2 + $0xe0] sm:$0xff]  ;;  %vm103_vm0 = vcmp.lt.s32.totalorder %v102_v38, 28 }
   0xb   :  { %62 = vmatpush.msra.mxu0 %v39_v2  ;;  %82 = vmatpush.msra.mxu1 %v57_v6  ;;  %v33_v14 = vld [vmem:[#allocation2 + $0x40] sm:$0xff]  ;;  %v52_v15 = vld [vmem:[#allocation2 + $0xd8] sm:$0xff]  ;;  %v51_v17 = vld [vmem:[#allocation2 + $0xd0] sm:$0xff] }
   0xc   :  { %v32_v16 = vld [vmem:[#allocation2 + $0x38] sm:$0xff]  ;;  %v31_v18 = vld [vmem:[#allocation2 + $0x30] sm:$0xff]  ;;  %v50_v19 = vld [vmem:[#allocation2 + $0xc8] sm:$0xff] }
   0xd   :  { %63 = vmatpush.msra.mxu0 %v38_v3  ;;  %83 = vmatpush.msra.mxu1 %v56_v7  ;;  %v30_v20 = vld [vmem:[#allocation2 + $0x28] sm:$0xff]  ;;  %v49_v21 = vld [vmem:[#allocation2 + $0xc0] sm:$0xff]  ;;  %v48_v23 = vld [vmem:[#allocation2 + $0xb8] sm:$0xff] }
   0xe   :  { %v29_v22 = vld [vmem:[#allocation2 + $0x20] sm:$0xff]  ;;  %v28_v24 = vld [vmem:[#allocation2 + $0x18] sm:$0xff]  ;;  %v47_v25 = vld [vmem:[#allocation2 + $0xb0] sm:$0xff] }
   0xf   :  { %64 = vmatpush.msra.mxu0 %v37_v5  ;;  %84 = vmatpush.msra.mxu1 %v55_v9  ;;  %v27_v26 = vld [vmem:[#allocation2 + $0x10] sm:$0xff]  ;;  %v46_v27 = vld [vmem:[#allocation2 + $0xa8] sm:$0xff]  ;;  %v25_v29 = vld [vmem:[#allocation2] sm:$0xff] }
  0x10   :  { %v26_v28 = vld [vmem:[#allocation2 + $0x8] sm:$0xff]  ;;  %v45_v30 = vld [vmem:[#allocation2 + $0xa0] sm:$0xff]  ;;  %v44_v31 = vld [vmem:[#allocation2 + $0x98] sm:$0xff] }
  0x11   :  { %65 = vmatpush.msra.mxu0 %v36_v8  ;;  %85 = vmatpush.msra.mxu1 %v54_v11  ;;  %v43_v32 = vld [vmem:[#allocation2 + $0x90] sm:$0xff]  ;;  %v42_v33 = vld [vmem:[#allocation2 + $0x88] sm:$0xff] }
  0x12   :  { %v59_v39 = vld [vmem:[#allocation2 + $0x110] sm:$0xff] }
  0x13   :  { %66 = vmatpush.msra.mxu0 %v35_v10  ;;  %86 = vmatpush.msra.mxu1 %v53_v13 }
  0x15   :  { %67 = vmatpush.msra.mxu0 %v34_v12  ;;  %87 = vmatpush.msra.mxu1 %v52_v15 }
  0x17   :  { %68 = vmatpush.msra.mxu0 %v33_v14  ;;  %88 = vmatpush.msra.mxu1 %v51_v17 }
  0x19   :  { %69 = vmatpush.msra.mxu0 %v32_v16  ;;  %89 = vmatpush.msra.mxu1 %v50_v19 }
  0x1b   :  { %70 = vmatpush.msra.mxu0 %v31_v18  ;;  %90 = vmatpush.msra.mxu1 %v49_v21 }
  0x1d   :  { %71 = vmatpush.msra.mxu0 %v30_v20  ;;  %91 = vmatpush.msra.mxu1 %v48_v23 }
  0x1f   :  { %72 = vmatpush.msra.mxu0 %v29_v22  ;;  %92 = vmatpush.msra.mxu1 %v47_v25 }
  0x21   :  { %73 = vmatpush.msra.mxu0 %v28_v24  ;;  %93 = vmatpush.msra.mxu1 %v46_v27 }
  0x23   :  { %74 = vmatpush.msra.mxu0 %v27_v26  ;;  %94 = vmatpush.msra.mxu1 %v45_v30 }
  0x25   :  { %75 = vmatpush.msra.mxu0 %v26_v28  ;;  %95 = vmatpush.msra.mxu1 %v44_v31 }
  0x26   :  { %76 = vmatmul.f32.vlgmr.msra.gmra.mxu0 %v25_v29 }
  0x27   :  { %96 = vmatpush.msra.mxu1 %v43_v32 }
  0xa3   :  { %v77_v34 = vpop.f32.mrf.mxu0 }
  0xa4   :  { %v78_v35 = vadd.f32 %v77_v34, %v42_v33 }
  0xa6   :  { %v80_v36 = vmax.f32 %v78_v35, 0.0 }
  0xa8   :  { %97 = vmatmul.f32.vlgmr.msra.gmra.mxu1 %v80_v36 }
 0x125   :  { %v98_v40 = vpop.f32.mrf.mxu1 }
 0x126   :  { %v99_v41 = vadd.f32 %v98_v40, %v59_v39 }
 0x128   :  { %v104_v42 = vsel %vm103_vm0, %v99_v41, -1e+30  ;;  %v155_v47 = vmul.f32 -1.442695, %v99_v41 }
 0x129   :  { %105 = vmax.xlane.f32.xlu0 %v104_v42 }
 0x19c   :  { %v106_v43 = vpop.xlane.xlu0 %105 }
 0x19d   :  { %v107_v44 = vsub.f32 %v104_v42, %v106_v43 }
 0x19f   :  { %v108_v45 = vmul.f32 1.442695, %v107_v44 }
 0x1a1   :  { %160 = vpow2.f32 %v108_v45 }
 0x1a2   :  { %162 = vpow2.f32 %v155_v47 }
 0x1a7   :  { %v161_v46 = vpop.eup %160 }
 0x1a8   :  { %110 = vadd.xlane.f32.xlu0 %v161_v46  ;;  %v163_v48 = vpop.eup %162 }
 0x1a9   :  { %v120_v49 = vadd.f32 1.0, %v163_v48 }
 0x1ab   :  { %164 = vrcp.f32 %v120_v49  ;;  %v132_v58 = vand.u32 2147483648, %v120_v49  ;;  %vm126_vm2 = vweird.f32 %v120_v49  ;;  %v130_v60 = vand.u32 2147483647, %v120_v49 }
 0x1ad   :  { %v133_v63 = vor.u32 1.1754944e-38, %v132_v58  ;;  %vm131_vm4 = vcmp.eq.f32.partialorder %v130_v60, 8.507059e+37 }
 0x1b1   :  { %v165_v50 = vpop.eup %164 }
 0x1b2   :  { %v122_v51 = vmul.f32 %v165_v50, %v120_v49  ;;  %vm127_vm1 = vweird.f32 %v165_v50 }
 0x1b3   :  { %vm128_vm3 = vmor %vm126_vm2, %vm127_vm1 }
 0x1b4   :  { %v123_v53 = vsub.f32 1.0, %v122_v51 }
 0x1b6   :  { %v124_v54 = vmul.f32 %v165_v50, %v123_v53 }
 0x1b8   :  { %v125_v57 = vadd.f32 %v165_v50, %v124_v54 }
 0x1ba   :  { %v129_v62 = vsel %vm128_vm3, %v165_v50, %v125_v57 }
 0x1bb   :  { %v134_v1 = vsel %vm131_vm4, %v133_v63, %v129_v62 }
 0x21b   :  { %v111_v52 = vpop.xlane.xlu0 %110 }
 0x21c   :  { %166 = vrcp.f32 %v111_v52 }
 0x222   :  { %v167_v55 = vpop.eup %166 }
 0x223   :  { %v113_v56 = vmul.f32 %v167_v55, %v111_v52 }
 0x225   :  { %v114_v59 = vsub.f32 2.0, %v113_v56 }
 0x227   :  { %v115_v61 = vmul.f32 %v167_v55, %v114_v59 }
 0x229   :  { %v116_v0 = vmul.f32 %v161_v46, %v115_v61 }
 0x22b   :  { %v136_v2 = vsel %vm103_vm0, %v116_v0, %v134_v1 }
 0x22c   :  { %137 = vst [vmem:[#allocation5] sm:$0xff] %v136_v2 }
 0x22d   :  { %148 = dma.vmem_to_hbm [thread:$0]  %s144_s13, 128, %s146_s16, [#allocation4]  }
 0x22e   :  { %218 = dma.done.wait [#allocation4], 128  }
 0x22f   :  { %219 = vsyncadd [#allocation4], 4294967168 }
 0x230   :  { %153 = vsyncpa [#allocation3], 1 }
 0x231   :  { %154 = vsyncpa [#allocation4], 1 }

</bundles_post_ra>
